<compile_context>
chip_gen: v5e
topology: v5e:2x2
jax: 0.10.0
libtpu: 0.0.40
codegen_flags: <defaults>
</compile_context>

<pallas_src>
import functools

import jax
import jax.numpy as jnp
from jax.experimental import pallas as pl
from jax.experimental.pallas import tpu as pltpu

_LANE = 128
_SUBLANE = 8


def _round_up(x, m):
    return ((x + m - 1) // m) * m


# ---------------------------------------------------------------------------
# Kernels
# ---------------------------------------------------------------------------

def _fused_head_kernel(x_ref, wf_ref, bf_ref, out_ref):
    # logits = x @ W_f + b_f  (W1/W2 pre-fused outside the hot path).
    x = x_ref[...]
    logits = jnp.dot(x, wf_ref[...].astype(x.dtype),
                     preferred_element_type=jnp.float32)
    out_ref[...] = (logits + bf_ref[...]).astype(out_ref.dtype)


def _two_stage_head_kernel(x_ref, w1_ref, b1_ref, w2_ref, b2_ref, out_ref):
    # Exact two-Linear form (bottleneck matmul kept explicit).
    x = x_ref[...]
    emb = jnp.dot(x, w1_ref[...].astype(x.dtype),
                  preferred_element_type=jnp.float32) + b1_ref[...]
    logits = jnp.dot(emb.astype(w2_ref.dtype), w2_ref[...],
                     preferred_element_type=jnp.float32) + b2_ref[...]
    out_ref[...] = logits.astype(out_ref.dtype)


# ---------------------------------------------------------------------------
# One-time parameter preparation (keep OUT of the per-call hot path)
# ---------------------------------------------------------------------------

def prepare_params(w1, b1, w2, b2, *, fuse=True, param_dtype=None):
    """nn.Linear layout in:  w1 (bottleneck, F), b1 (bottleneck,)
                             w2 (C, bottleneck), b2 (C,).

    Returns (in, out)-layout parameters with lane (last) dims zero-padded to
    multiples of 128 (exact; padded class columns are sliced off by the
    wrapper):
      fuse=True  -> (w_f (F, C_p), b_f (1, C_p))
      fuse=False -> (w1_t (F, BF_p), b1 (1, BF_p), w2_t (BF_p, C_p), b2 (1, C_p))
    `param_dtype` (e.g. jnp.bfloat16) optionally down-casts the weight
    matrices to halve their HBM traffic; accumulation stays f32 in-kernel.
    """
    bf, f = w1.shape
    c = w2.shape[0]
    bf_p = _round_up(bf, _LANE)
    c_p = _round_up(c, _LANE)
    w_dt = param_dtype if param_dtype is not None else w1.dtype

    if fuse:
        # No nonlinearity between the Linears -> fuse in f32 once.
        w_f = w1.T.astype(jnp.float32) @ w2.T.astype(jnp.float32)          # (F, C)
        b_f = b1.astype(jnp.float32) @ w2.T.astype(jnp.float32) + b2.astype(jnp.float32)
        w_fp = jnp.zeros((f, c_p), w_dt).at[:, :c].set(w_f.astype(w_dt))
        b_fp = jnp.zeros((1, c_p), jnp.float32).at[:, :c].set(b_f)
        return (w_fp, b_fp)

    w1_t = jnp.zeros((f, bf_p), w_dt).at[:, :bf].set(w1.T.astype(w_dt))
    b1_r = jnp.zeros((1, bf_p), jnp.float32).at[:, :bf].set(b1.astype(jnp.float32))
    w2_t = jnp.zeros((bf_p, c_p), w_dt).at[:bf, :c].set(w2.T.astype(w_dt))
    b2_r = jnp.zeros((1, c_p), jnp.float32).at[:, :c].set(b2.astype(jnp.float32))
    return (w1_t, b1_r, w2_t, b2_r)


# ---------------------------------------------------------------------------
# Forward
# ---------------------------------------------------------------------------

def _vmem_byte_cap():
    """Generation-aware VMEM cap: physical capacity minus headroom."""
    try:
        cap = int(pltpu.get_tpu_info().vmem_capacity_bytes)
    except Exception:                       # unknown generation -> be safe
        cap = 64 << 20
    return max(cap - (8 << 20), 32 << 20)


def _resident_spec(shape):
    """Constant-index block: stays in VMEM for the whole grid.  Buffered(1)
    drops the redundant second pipeline buffer (matters for large F on v7x's
    64 MiB VMEM); fall back to the default buffering if unsupported."""
    try:
        return pl.BlockSpec(shape, lambda i: (0, 0),
                            pipeline_mode=pl.Buffered(1))
    except Exception:
        return pl.BlockSpec(shape, lambda i: (0, 0))


@functools.partial(jax.jit, static_argnames=("num_classes", "block_batch"))
def bottleneck_head_forward(x, params, *, num_classes, block_batch=512):
    """x: (B, num_features).  `params` is the tuple from prepare_params.
    Returns logits of shape (B, num_classes)."""
    B, F = x.shape
    fused = len(params) == 2
    C_p = params[-1].shape[-1]

    # ---- Batch tiling: no wrapper-side padding.  Pallas masks the partial
    # boundary block; garbage rows only reach discarded output rows.
    if B < 2 * _SUBLANE:
        TB = B                                    # single full-extent block
    else:
        bb = max(_SUBLANE, (block_batch // _SUBLANE) * _SUBLANE)
        # >= 2 sublane-aligned tiles so the "parallel" axis can shard across
        # both TensorCores on v7x; capped at bb for the HBM-roofline sweet spot.
        TB = min(bb, _round_up(pl.cdiv(B, 2), _SUBLANE))
    grid = (pl.cdiv(B, TB),)

    # ---- VMEM accounting (params counted at 2 buffers in case the
    # Buffered(1) request is not honored; x/out tiles double-buffered).
    itemsize_x = jnp.dtype(x.dtype).itemsize
    param_bytes = sum(int(p.size) * jnp.dtype(p.dtype).itemsize for p in params)
    streamed = 2 * TB * (F + C_p) * itemsize_x
    needed = 2 * param_bytes + streamed
    vmem_limit = int(min(max(int(1.25 * needed) + (4 << 20), 32 << 20),
                         _vmem_byte_cap()))

    # ---- Cost estimate so XLA can overlap the head with neighbors.
    if fused:
        flops = 2 * B * F * C_p
    else:
        BF_p = params[0].shape[1]
        flops = 2 * B * F * BF_p + 2 * B * BF_p * C_p
    bytes_accessed = B * F * itemsize_x + param_bytes + B * C_p * itemsize_x

    x_spec = pl.BlockSpec((TB, F), lambda i: (i, 0))       # streamed
    out_spec = pl.BlockSpec((TB, C_p), lambda i: (i, 0))   # streamed, lane-dense
    param_specs = [_resident_spec(p.shape) for p in params]

    kernel = _fused_head_kernel if fused else _two_stage_head_kernel

    out = pl.pallas_call(
        kernel,
        out_shape=jax.ShapeDtypeStruct((B, C_p), x.dtype),
        grid=grid,
        in_specs=[x_spec] + param_specs,
        out_specs=out_spec,
        compiler_params=pltpu.CompilerParams(
            dimension_semantics=("parallel",),
            vmem_limit_bytes=vmem_limit),
        cost_estimate=pl.CostEstimate(flops=flops, transcendentals=0,
                                      bytes_accessed=bytes_accessed),
    )(x, *params)

    # Only post-kernel op: drop the zero-padded class lanes (kernel keeps the
    # lane-dense 128-wide stores; consumers may also take the padded output).
    return out[:, :num_classes]


# ---------------------------------------------------------------------------
# Synthetic init matching the PyTorch module's shapes
# ---------------------------------------------------------------------------

def init_params(key, num_features, num_classes, bottleneck_features=200):
    k1, k2, k3, k4 = jax.random.split(key, 4)
    s1 = 1.0 / jnp.sqrt(num_features)
    s2 = 1.0 / jnp.sqrt(bottleneck_features)
    w1 = jax.random.uniform(k1, (bottleneck_features, num_features),
                            jnp.float32, -s1, s1)
    b1 = jax.random.uniform(k2, (bottleneck_features,), jnp.float32, -s1, s1)
    w2 = jax.random.uniform(k3, (num_classes, bottleneck_features),
                            jnp.float32, -s2, s2)
    b2 = jax.random.uniform(k4, (num_classes,), jnp.float32, -s2, s2)
    return w1, b1, w2, b2


if __name__ == "__main__":
    batch = 2
    num_features = 32
    num_classes = 10
    bottleneck_features = 200

    key = jax.random.PRNGKey(0)
    kx, kp = jax.random.split(key)
    x = jax.random.normal(kx, (batch, num_features), jnp.float32)
    w1, b1, w2, b2 = init_params(kp, num_features, num_classes,
                                 bottleneck_features)

    # Plain-JAX reference (same math as the PyTorch forward).
    ref = (x @ w1.T + b1) @ w2.T + b2

    # Default path: W1/W2 pre-fused into one (F, 128) weight.
    fused_params = prepare_params(w1, b1, w2, b2, fuse=True)
    logits = bottleneck_head_forward(x, fused_params, num_classes=num_classes)
    jax.block_until_ready(logits)
    assert logits.shape == (batch, num_classes)
    assert jnp.allclose(logits, ref, atol=1e-4, rtol=1e-4)

    # Exact two-Linear path (bottleneck matmul kept explicit).
    two_stage_params = prepare_params(w1, b1, w2, b2, fuse=False)
    logits2 = bottleneck_head_forward(x, two_stage_params,
                                      num_classes=num_classes)
    jax.block_until_ready(logits2)
    assert logits2.shape == (batch, num_classes)
    assert jnp.allclose(logits2, ref, atol=1e-4, rtol=1e-4)

    print("KERNEL_OK")
</pallas_src>

<mosaic_0001>
module attributes {stable_mosaic.version = 11 : i64} {
  func.func @_fused_head_kernel(%arg0: i32, %arg1: memref<2x32xf32, #tpu.memory_space<vmem>>, %arg2: memref<32x128xf32, #tpu.memory_space<vmem>>, %arg3: memref<1x128xf32, #tpu.memory_space<vmem>>, %arg4: memref<2x128xf32, #tpu.memory_space<vmem>>) attributes {dimension_semantics = [#tpu.dimension_semantics<parallel>], iteration_bounds = array<i64: 1>, scalar_prefetch = 0 : i64, scratch_operands = 0 : i64, tpu.core_type = #tpu.core_type<tc>, window_params = [{transform_indices = @transform_0, window_bounds = array<i64: 2, 32>}, {pipeline_mode = #tpu.pipeline_mode<synchronous>, transform_indices = @transform_1, window_bounds = array<i64: 32, 128>}, {pipeline_mode = #tpu.pipeline_mode<synchronous>, transform_indices = @transform_2, window_bounds = array<i64: 1, 128>}, {transform_indices = @transform_3, window_bounds = array<i64: 2, 128>}]} {
    %c0 = arith.constant 0 : index
    %c0_0 = arith.constant 0 : index
    %0 = vector.load %arg1[%c0, %c0_0] : memref<2x32xf32, #tpu.memory_space<vmem>>, vector<2x32xf32>
    %c0_1 = arith.constant 0 : index
    %c0_2 = arith.constant 0 : index
    %1 = vector.load %arg2[%c0_1, %c0_2] : memref<32x128xf32, #tpu.memory_space<vmem>>, vector<32x128xf32>
    %cst = arith.constant dense<0.000000e+00> : vector<2x128xf32>
    %2 = tpu.matmul %0, %1, %cst {dimension_numbers = #tpu.dot_dimension_numbers<[1], [0], [0], [1], [0, 0, 1, 1], [], []>} : vector<2x32xf32>, vector<32x128xf32>, vector<2x128xf32> -> vector<2x128xf32>
    %c0_3 = arith.constant 0 : index
    %c0_4 = arith.constant 0 : index
    %3 = vector.load %arg3[%c0_3, %c0_4] : memref<1x128xf32, #tpu.memory_space<vmem>>, vector<1x128xf32>
    %4 = vector.broadcast %3 : vector<1x128xf32> to vector<2x128xf32>
    %5 = arith.addf %2, %4 : vector<2x128xf32>
    %c0_5 = arith.constant 0 : index
    %c0_6 = arith.constant 0 : index
    %6 = vector.load %arg4[%c0_5, %c0_6] : memref<2x128xf32, #tpu.memory_space<vmem>>, vector<2x128xf32>
    tpu.vector_store %arg4[%c0_5, %c0_6], %5 {strides = array<i32>} : memref<2x128xf32, #tpu.memory_space<vmem>>, vector<2x128xf32>,
    return
  }
  func.func @transform_0(%arg0: i32) -> (i32, i32) {
    %c0_i32 = arith.constant 0 : i32
    %c0_i32_0 = arith.constant 0 : i32
    return %arg0, %c0_i32 : i32, i32
  }
  func.func @transform_1(%arg0: i32) -> (i32, i32) {
    %c0_i32 = arith.constant 0 : i32
    %c0_i32_0 = arith.constant 0 : i32
    %c0_i32_1 = arith.constant 0 : i32
    return %c0_i32, %c0_i32_0 : i32, i32
  }
  func.func @transform_2(%arg0: i32) -> (i32, i32) {
    %c0_i32 = arith.constant 0 : i32
    %c0_i32_0 = arith.constant 0 : i32
    %c0_i32_1 = arith.constant 0 : i32
    return %c0_i32, %c0_i32_0 : i32, i32
  }
  func.func @transform_3(%arg0: i32) -> (i32, i32) {
    %c0_i32 = arith.constant 0 : i32
    %c0_i32_0 = arith.constant 0 : i32
    return %arg0, %c0_i32 : i32, i32
  }
}

</mosaic_0001>

<bundles_post_ra>
// kernel: bottleneck_head_forward.1
= control target key start
LH: loop header
LB: loop body
LE: loop exit
PB: predicated region body
PF: predicated region fallthrough
CT: control target
= control target key end

     0   :  { %8 = vsyncpa [#allocation3], 0  ;;  %s219_s0 = inlined_call_operand.hbm [shape: f32[2,32], index: 0, kind: input, shape index: {}]   ;;  %s220_s1 = inlined_call_operand.hbm [shape: f32[32,128], index: 1, kind: input, shape index: {}]   ;;  %s221_s2 = inlined_call_operand.vmem [shape: f32[1,128], index: 2, kind: input, shape index: {}]   ;;  %s222_s3 = inlined_call_operand.hbm [shape: f32[2,128], index: 3, kind: output, shape index: {}]  }
   0x1   :  { %9 = vsyncpa [#allocation6], 0 }
   0x2   :  { %10 = vsyncpa [#allocation4], 0  ;;  %s16_s14 = sshll.u32 %s219_s0, 4  ;;  %s182_s15 = smov [#allocation2]   ;;  %s17_s14 = int_to_ptr.hbm [resolvable:$true] %s16_s14 }
   0x3   :  { %s18_s16 = sshll.u32 %s182_s15, 4  ;;  %s26_s19 = sshll.u32 %s220_s1, 4  ;;  %s19_s16 = int_to_ptr.vmem [resolvable:$true] %s18_s16  ;;  %s27_s19 = int_to_ptr.hbm [resolvable:$true] %s26_s19 }
   0x4   :  { %21 = dma.hbm_to_vmem [thread:$0]  %s17_s14, 32, %s19_s16, [#allocation3]  }
   0x5   :  { %s183_s20 = smov [#allocation5]   ;;  %s184_s22 = smov 128  }
   0x6   :  { %s28_s21 = sshll.u32 %s183_s20, 4  ;;  %s185_s23 = smov 8   ;;  %s29_s21 = int_to_ptr.vmem [resolvable:$true] %s28_s21 }
   0x7   :  { %34 = dma.hbm_to_vmem [thread:$0]  %s27_s19, 512, %s29_s21, [#allocation6], %s184_s22, %s184_s22, %s185_s23  }
   0x8   :  { %176 = dma.done.wait [#allocation3], 32  }
   0x9   :  { %177 = vsyncadd [#allocation3], 4294967264 }
   0xa   :  { %178 = dma.done.wait [#allocation6], 512  }
   0xb   :  { %179 = vsyncadd [#allocation6], 4294966784  ;;  %v49_v0 = vld [vmem:[#allocation5 + $0x18] sm:$0xff]  ;;  %v48_v1 = vld [vmem:[#allocation5 + $0x10] sm:$0xff]  ;;  %vm54_vm0 = vcmask 261120   ;;  %s186_s24 = smov [#allocation7]  }
   0xc   :  { %70 = vmatpush.msra.mxu0 %v49_v0  ;;  %v47_v2 = vld [vmem:[#allocation5 + $0x8] sm:$0xff]  ;;  %v46_v3 = vld [vmem:[#allocation5] sm:$0xff]  ;;  %v45_v4 = vld [vmem:[#allocation2] sm:$0x3]  ;;  %s84_s25 = sshll.u32 %s186_s24, 4  ;;  %s86_s28 = sshll.u32 %s222_s3, 4  ;;  %s85_s25 = int_to_ptr.vmem [resolvable:$true] %s84_s25  ;;  %s87_s28 = int_to_ptr.hbm [resolvable:$true] %s86_s28 }
   0xd   :  { %v103_v5 = vld [vmem:[%s221_s2] ss:$0 sm:$0xff] }
   0xe   :  { %71 = vmatpush.msra.mxu0 %v48_v1 }
  0x10   :  { %72 = vmatpush.msra.mxu0 %v47_v2 }
  0x12   :  { %73 = vmatpush.msra.mxu0 %v46_v3 }
  0x13   :  { %97 = vmatmul.msk.f32.vlgmr.msra.gmra.mxu0 %vm54_vm0, %v45_v4 }
  0x90   :  { %v75_v6 = vpop.f32.mrf.mxu0 }
  0x91   :  { %v76_v7 = vadd.f32 %v103_v5, %v75_v6 }
  0x93   :  { %78 = vst [vmem:[#allocation7] sm:$0x3] %v76_v7 }
  0x94   :  { %89 = dma.vmem_to_hbm [thread:$0]  %s85_s25, 32, %s87_s28, [#allocation4]  }
  0x95   :  { %180 = dma.done.wait [#allocation4], 32  }
  0x96   :  { %181 = vsyncadd [#allocation4], 4294967264 }
  0x97   :  { %94 = vsyncpa [#allocation3], 1 }
  0x98   :  { %95 = vsyncpa [#allocation6], 1 }
  0x99   :  { %96 = vsyncpa [#allocation4], 1 }

</bundles_post_ra>
